<compile_context>
chip_gen: v7x
topology: tpu7x:2x2x1
jax: 0.10.0
libtpu: 0.0.40
codegen_flags: <defaults>
</compile_context>

<pallas_src>
import numpy as np
import jax
import jax.numpy as jnp
from jax.experimental import pallas as pl
from jax.experimental.pallas import tpu as pltpu

LANES = 128


def gtconv_kernel(filt_ref, a_ref, o_ref):
    """filt_ref: (C_out, C_in) f32 in SMEM (softmax already applied, hoisted).
    a_ref:    (C_in, rows_tile, 128) adjacency tile in VMEM.
    o_ref:    (C_out, rows_tile, 128) output tile in VMEM.
    VPU channel mix, c-outer / o-inner: each a_ref[c] slab is loaded once and
    reused for every output channel (halves vld pressure vs. o-outer)."""
    c_out, c_in = filt_ref.shape
    # Hoist all SMEM scalar reads out of the accumulate loop.
    f = [[filt_ref[o, c] for c in range(c_in)] for o in range(c_out)]
    acc = [None] * c_out
    for c in range(c_in):
        a = a_ref[c].astype(jnp.float32)          # one VMEM load per channel
        for o in range(c_out):
            t = f[o][c] * a
            acc[o] = t if acc[o] is None else acc[o] + t
    for o in range(c_out):
        o_ref[o] = acc[o].astype(o_ref.dtype)


def _vmem_capacity_bytes():
    try:
        cap = getattr(pltpu.get_tpu_info(), "vmem_capacity_bytes", None)
        if cap:
            return int(cap)
    except Exception:
        pass
    return 64 * 1024 * 1024          # most conservative: v7x per-TensorCore VMEM


def _plan_tiling(num_nodes, c_in, c_out, dtype):
    """Pick rows_tile / rows_padded / vmem_limit for the (rows, 128) layout."""
    itemsize = jnp.dtype(dtype).itemsize
    sublane = max(8, 32 // itemsize)              # 8 (f32), 16 (bf16), 32 (i8)
    nn_flat = num_nodes * num_nodes
    rows_total = pl.cdiv(nn_flat, LANES)

    vmem_cap = _vmem_capacity_bytes()
    budget = (vmem_cap * 3) // 8                  # ~24 MiB @ 64 MiB, ~48 MiB @ 128 MiB
    # Live bytes per tile row: 3-deep A buffers + double-buffered output.
    bytes_per_row = (3 * c_in + 2 * c_out) * LANES * itemsize
    max_rows = max(sublane, (budget // bytes_per_row) // sublane * sublane)
    rows_tile = max(sublane, (min(4096, max_rows) // sublane) * sublane)

    if rows_total <= rows_tile:
        rows_tile = rows_total                    # single full-extent block (always legal)
        rows_padded = rows_total
    else:
        rows_padded = pl.cdiv(rows_total, rows_tile) * rows_tile

    working = (3 * c_in + 2 * c_out) * rows_tile * LANES * itemsize
    vmem_limit = int(min(vmem_cap, working + (4 << 20)))
    return nn_flat, rows_total, rows_tile, rows_padded, vmem_limit


def edges_to_blocked(A_list, num_nodes, rows_padded, dtype):
    """Scatter sparse edge lists straight into the padded, lane-dense
    (C_in, rows_padded, 128) layout the kernel consumes (no pad/relayout pass).
    Duplicate edges are coalesced (summed) by the scatter-add."""
    c_in = len(A_list)
    nn_padded = rows_padded * LANES
    flat = jnp.zeros((c_in, nn_padded), jnp.float32)
    for j, (edge_index, edge_value) in enumerate(A_list):
        lin = edge_index[0].astype(jnp.int32) * num_nodes + edge_index[1].astype(jnp.int32)
        flat = flat.at[j, lin].add(edge_value.astype(jnp.float32))
    if flat.dtype != jnp.dtype(dtype):
        flat = flat.astype(dtype)
    return flat.reshape(c_in, rows_padded, LANES)


def gtconv_apply(weight, a_blk, *, rows_tile, vmem_limit_bytes):
    """a_blk: (C_in, rows_padded, 128) -> (C_out, rows_padded, 128)."""
    c_in, rows_padded, lanes = a_blk.shape
    c_out = weight.shape[0]
    grid_steps = rows_padded // rows_tile

    # Hoisted softmax: tiny (C_out, C_in) scalar table lives in SMEM.
    filt = jax.nn.softmax(weight.astype(jnp.float32), axis=1)

    a_idx = lambda j: (0, j, 0)
    a_spec = pl.BlockSpec((c_in, rows_tile, lanes), a_idx)
    if grid_steps > 1 and hasattr(pl, "Buffered"):
        try:  # 3-deep input pipeline hides per-channel strided DMA startup.
            a_spec = pl.BlockSpec((c_in, rows_tile, lanes), a_idx,
                                  pipeline_mode=pl.Buffered(3))
        except TypeError:
            pass

    itemsize = jnp.dtype(a_blk.dtype).itemsize
    return pl.pallas_call(
        gtconv_kernel,
        out_shape=jax.ShapeDtypeStruct((c_out, rows_padded, lanes), a_blk.dtype),
        grid_spec=pltpu.PrefetchScalarGridSpec(
            num_scalar_prefetch=0,
            grid=(grid_steps,),
            in_specs=[
                pl.BlockSpec(memory_space=pltpu.MemorySpace.SMEM),   # softmaxed filter
                a_spec,
            ],
            out_specs=pl.BlockSpec((c_out, rows_tile, lanes), lambda j: (0, j, 0)),
        ),
        compiler_params=pltpu.CompilerParams(
            dimension_semantics=("parallel",),       # megacore-shards rows on v7x
            vmem_limit_bytes=vmem_limit_bytes),
        cost_estimate=pl.CostEstimate(
            flops=2 * c_out * c_in * rows_padded * lanes,
            transcendentals=0,
            bytes_accessed=(c_in + c_out) * rows_padded * lanes * itemsize),
    )(filt, a_blk)


def gtconv_forward(weight, A_list, num_nodes, dtype=jnp.float32):
    """Full forward: sparse edge lists -> padded blocked dense mix per out channel."""
    c_in = len(A_list)
    c_out = weight.shape[0]
    _, _, rows_tile, rows_padded, vmem_limit = _plan_tiling(num_nodes, c_in, c_out, dtype)
    a_blk = edges_to_blocked(A_list, num_nodes, rows_padded, dtype)
    out_blk = gtconv_apply(weight, a_blk, rows_tile=rows_tile,
                           vmem_limit_bytes=vmem_limit)
    return out_blk


def gtconv_sparse_outputs(out_blk, A_list, num_nodes):
    """Recreate the module's list-of-(index, value) outputs: union of all input
    edges, coalesced (sorted row-major, duplicates merged), values gathered
    directly from the padded flat kernel output via linear index r*N + c."""
    # TODO(synk): coalesce/COO bookkeeping is host-side glue, not a Pallas kernel.
    all_idx = np.concatenate([np.asarray(ei) for ei, _ in A_list], axis=1)   # (2, sumE)
    lin = all_idx[0].astype(np.int64) * num_nodes + all_idx[1].astype(np.int64)
    lin_u = np.unique(lin)                            # sorted row-major, deduped
    rows = (lin_u // num_nodes).astype(np.int32)
    cols = (lin_u % num_nodes).astype(np.int32)
    index = jnp.stack([jnp.asarray(rows), jnp.asarray(cols)], axis=0)
    out_flat = np.asarray(out_blk).reshape(out_blk.shape[0], -1)  # host view of padded flat
    results = [(index, jnp.asarray(out_flat[i, lin_u])) for i in range(out_flat.shape[0])]
    return results


if __name__ == "__main__":
    # Small, deterministic problem: 4 edge types (in_channels), 2 output
    # channels, 16 nodes, 24 edges per edge type.
    in_channels = 4
    out_channels = 2
    num_nodes = 16
    n_edges = 24

    key = jax.random.PRNGKey(0)
    k_w, k_e = jax.random.split(key)

    # Parameter init: nn.init.normal_(self.weight, std=0.01); bias is None.
    weight = 0.01 * jax.random.normal(k_w, (out_channels, in_channels), jnp.float32)

    # Synthetic sparse input A: list of (edge_index, edge_value) per edge type.
    A_list = []
    for _ in range(in_channels):
        k_e, k_r, k_c, k_v = jax.random.split(k_e, 4)
        rows = jax.random.randint(k_r, (n_edges,), 0, num_nodes, jnp.int32)
        cols = jax.random.randint(k_c, (n_edges,), 0, num_nodes, jnp.int32)
        vals = jax.random.uniform(k_v, (n_edges,), jnp.float32, 0.1, 1.0)
        A_list.append((jnp.stack([rows, cols], axis=0), vals))

    out_blk = gtconv_forward(weight, A_list, num_nodes)          # (C_out, rows, 128)
    out_blk = jax.block_until_ready(out_blk)

    # Reference check in plain numpy (dense, f64).
    nn_flat = num_nodes * num_nodes
    a_dense = np.zeros((in_channels, nn_flat), np.float64)
    for j, (ei, ev) in enumerate(A_list):
        ei_np = np.asarray(ei)
        lin = ei_np[0].astype(np.int64) * num_nodes + ei_np[1].astype(np.int64)
        np.add.at(a_dense[j], lin, np.asarray(ev, np.float64))
    w_np = np.asarray(weight, np.float64)
    f_np = np.exp(w_np - w_np.max(axis=1, keepdims=True))
    f_np = f_np / f_np.sum(axis=1, keepdims=True)
    ref = np.einsum("oc,cp->op", f_np, a_dense)
    got = np.asarray(out_blk).reshape(out_channels, -1)[:, :nn_flat]
    assert np.allclose(got, ref, atol=1e-5, rtol=1e-5)

    # Recover the module's sparse (index, value) output list per out channel.
    results = gtconv_sparse_outputs(out_blk, A_list, num_nodes)
    assert len(results) == out_channels
    for idx, val in results:
        jax.block_until_ready(val)
        assert idx.shape[0] == 2 and idx.shape[1] == val.shape[0]

    print("KERNEL_OK")
</pallas_src>

<mosaic_0001>
module attributes {stable_mosaic.version = 11 : i64} {
  func.func @gtconv_kernel(%arg0: i32, %arg1: memref<2x4xf32, #tpu.memory_space<smem>>, %arg2: memref<4x2x128xf32, #tpu.memory_space<vmem>>, %arg3: memref<2x2x128xf32, #tpu.memory_space<vmem>>) attributes {dimension_semantics = [#tpu.dimension_semantics<parallel>], iteration_bounds = array<i64: 1>, scalar_prefetch = 0 : i64, scratch_operands = 0 : i64, tpu.core_type = #tpu.core_type<tc>, window_params = [{transform_indices = @transform_0, window_bounds = array<i64: 2, 4>}, {transform_indices = @transform_1, window_bounds = array<i64: 4, 2, 128>}, {transform_indices = @transform_2, window_bounds = array<i64: 2, 2, 128>}]} {
    %c0 = arith.constant 0 : index
    %c0_0 = arith.constant 0 : index
    %0 = memref.load %arg1[%c0, %c0_0] : memref<2x4xf32, #tpu.memory_space<smem>>
    %c0_1 = arith.constant 0 : index
    %c1 = arith.constant 1 : index
    %1 = memref.load %arg1[%c0_1, %c1] : memref<2x4xf32, #tpu.memory_space<smem>>
    %c0_2 = arith.constant 0 : index
    %c2 = arith.constant 2 : index
    %2 = memref.load %arg1[%c0_2, %c2] : memref<2x4xf32, #tpu.memory_space<smem>>
    %c0_3 = arith.constant 0 : index
    %c3 = arith.constant 3 : index
    %3 = memref.load %arg1[%c0_3, %c3] : memref<2x4xf32, #tpu.memory_space<smem>>
    %c1_4 = arith.constant 1 : index
    %c0_5 = arith.constant 0 : index
    %4 = memref.load %arg1[%c1_4, %c0_5] : memref<2x4xf32, #tpu.memory_space<smem>>
    %c1_6 = arith.constant 1 : index
    %c1_7 = arith.constant 1 : index
    %5 = memref.load %arg1[%c1_6, %c1_7] : memref<2x4xf32, #tpu.memory_space<smem>>
    %c1_8 = arith.constant 1 : index
    %c2_9 = arith.constant 2 : index
    %6 = memref.load %arg1[%c1_8, %c2_9] : memref<2x4xf32, #tpu.memory_space<smem>>
    %c1_10 = arith.constant 1 : index
    %c3_11 = arith.constant 3 : index
    %7 = memref.load %arg1[%c1_10, %c3_11] : memref<2x4xf32, #tpu.memory_space<smem>>
    %c0_12 = arith.constant 0 : index
    %c0_13 = arith.constant 0 : index
    %c0_14 = arith.constant 0 : index
    %8 = vector.load %arg2[%c0_12, %c0_13, %c0_14] : memref<4x2x128xf32, #tpu.memory_space<vmem>>, vector<1x2x128xf32>
    %9 = vector.shape_cast %8 : vector<1x2x128xf32> to vector<2x128xf32>
    %10 = vector.broadcast %0 : f32 to vector<2x128xf32>
    %11 = arith.mulf %10, %9 : vector<2x128xf32>
    %12 = vector.broadcast %4 : f32 to vector<2x128xf32>
    %13 = arith.mulf %12, %9 : vector<2x128xf32>
    %c1_15 = arith.constant 1 : index
    %c0_16 = arith.constant 0 : index
    %c0_17 = arith.constant 0 : index
    %14 = vector.load %arg2[%c1_15, %c0_16, %c0_17] : memref<4x2x128xf32, #tpu.memory_space<vmem>>, vector<1x2x128xf32>
    %15 = vector.shape_cast %14 : vector<1x2x128xf32> to vector<2x128xf32>
    %16 = vector.broadcast %1 : f32 to vector<2x128xf32>
    %17 = arith.mulf %16, %15 : vector<2x128xf32>
    %18 = arith.addf %11, %17 : vector<2x128xf32>
    %19 = vector.broadcast %5 : f32 to vector<2x128xf32>
    %20 = arith.mulf %19, %15 : vector<2x128xf32>
    %21 = arith.addf %13, %20 : vector<2x128xf32>
    %c2_18 = arith.constant 2 : index
    %c0_19 = arith.constant 0 : index
    %c0_20 = arith.constant 0 : index
    %22 = vector.load %arg2[%c2_18, %c0_19, %c0_20] : memref<4x2x128xf32, #tpu.memory_space<vmem>>, vector<1x2x128xf32>
    %23 = vector.shape_cast %22 : vector<1x2x128xf32> to vector<2x128xf32>
    %24 = vector.broadcast %2 : f32 to vector<2x128xf32>
    %25 = arith.mulf %24, %23 : vector<2x128xf32>
    %26 = arith.addf %18, %25 : vector<2x128xf32>
    %27 = vector.broadcast %6 : f32 to vector<2x128xf32>
    %28 = arith.mulf %27, %23 : vector<2x128xf32>
    %29 = arith.addf %21, %28 : vector<2x128xf32>
    %c3_21 = arith.constant 3 : index
    %c0_22 = arith.constant 0 : index
    %c0_23 = arith.constant 0 : index
    %30 = vector.load %arg2[%c3_21, %c0_22, %c0_23] : memref<4x2x128xf32, #tpu.memory_space<vmem>>, vector<1x2x128xf32>
    %31 = vector.shape_cast %30 : vector<1x2x128xf32> to vector<2x128xf32>
    %32 = vector.broadcast %3 : f32 to vector<2x128xf32>
    %33 = arith.mulf %32, %31 : vector<2x128xf32>
    %34 = arith.addf %26, %33 : vector<2x128xf32>
    %35 = vector.broadcast %7 : f32 to vector<2x128xf32>
    %36 = arith.mulf %35, %31 : vector<2x128xf32>
    %37 = arith.addf %29, %36 : vector<2x128xf32>
    %c0_24 = arith.constant 0 : index
    %c0_25 = arith.constant 0 : index
    %c0_26 = arith.constant 0 : index
    %38 = vector.load %arg3[%c0_24, %c0_25, %c0_26] : memref<2x2x128xf32, #tpu.memory_space<vmem>>, vector<1x2x128xf32>
    %39 = vector.shape_cast %38 : vector<1x2x128xf32> to vector<2x128xf32>
    %40 = vector.shape_cast %34 : vector<2x128xf32> to vector<1x2x128xf32>
    tpu.vector_store %arg3[%c0_24, %c0_25, %c0_26], %40 {strides = array<i32>} : memref<2x2x128xf32, #tpu.memory_space<vmem>>, vector<1x2x128xf32>,
    %c1_27 = arith.constant 1 : index
    %c0_28 = arith.constant 0 : index
    %c0_29 = arith.constant 0 : index
    %41 = vector.load %arg3[%c1_27, %c0_28, %c0_29] : memref<2x2x128xf32, #tpu.memory_space<vmem>>, vector<1x2x128xf32>
    %42 = vector.shape_cast %41 : vector<1x2x128xf32> to vector<2x128xf32>
    %43 = vector.shape_cast %37 : vector<2x128xf32> to vector<1x2x128xf32>
    tpu.vector_store %arg3[%c1_27, %c0_28, %c0_29], %43 {strides = array<i32>} : memref<2x2x128xf32, #tpu.memory_space<vmem>>, vector<1x2x128xf32>,
    return
  }
  func.func @transform_0(%arg0: i32) -> (i32, i32) {
    %c0_i32 = arith.constant 0 : i32
    %c0_i32_0 = arith.constant 0 : i32
    %c0_i32_1 = arith.constant 0 : i32
    return %c0_i32, %c0_i32_0 : i32, i32
  }
  func.func @transform_1(%arg0: i32) -> (i32, i32, i32) {
    %c0_i32 = arith.constant 0 : i32
    %c0_i32_0 = arith.constant 0 : i32
    %c0_i32_1 = arith.constant 0 : i32
    return %c0_i32, %arg0, %c0_i32_0 : i32, i32, i32
  }
  func.func @transform_2(%arg0: i32) -> (i32, i32, i32) {
    %c0_i32 = arith.constant 0 : i32
    %c0_i32_0 = arith.constant 0 : i32
    %c0_i32_1 = arith.constant 0 : i32
    return %c0_i32, %arg0, %c0_i32_0 : i32, i32, i32
  }
}

</mosaic_0001>

<bundles_post_ra>
// kernel: tpu_custom_call.1
= control target key start
LH: loop header
LB: loop body
LE: loop exit
PB: predicated region body
PF: predicated region fallthrough
CT: control target
= control target key end

     0   :  { %7 = vsyncpa [#allocation5], 0  ;;  %s229_s0 = inlined_call_operand.hbm [shape: f32[2,4], index: 0, kind: input, shape index: {}]   ;;  %s230_s1 = inlined_call_operand.hbm [shape: f32[4,2,128], index: 1, kind: input, shape index: {}]   ;;  %s231_s2 = inlined_call_operand.hbm [shape: f32[2,2,128], index: 2, kind: output, shape index: {}]  }
   0x1   :  { %8 = vsyncpa [#allocation3], 0 }
   0x2   :  { %9 = vsyncpa [#allocation4], 0  ;;  %s107_s11 = scalar_lea.hbm %s229_s0, 32 }
   0x3   :  { %p108_p0 = scmp.ne.s32.totalorder %s229_s0, %s107_s11  ;;  %p111_p1 = scmp.lt.u32.totalorder %s107_s11, %s229_s0 }
   0x5   :  { %p113_p2 = pnand %p111_p1, %p108_p0 }
   0x7   :  { %116 = shalt.err (!%p113_p2)
}
   0x8   :  { %s167_s16 = smov [#allocation2]   ;;  %s168_s19 = smov [#allocation6]  }
   0x9   :  { %17 = dma.hbm_to_smem %s229_s0, 32, %s167_s16, [#allocation5]  }
   0xa   :  { %s23_s20 = sshll.u32 %s168_s19, 4  ;;  %s117_s23 = scalar_lea.hbm %s230_s1, 128  ;;  %s24_s20 = int_to_ptr.vmem [resolvable:$true] %s23_s20 }
   0xb   :  { %p118_p3 = scmp.ne.s32.totalorder %s230_s1, %s117_s23  ;;  %p121_p4 = scmp.lt.u32.totalorder %s117_s23, %s230_s1 }
   0xd   :  { %p123_p5 = pnand %p121_p4, %p118_p3 }
   0xf   :  { %126 = shalt.err (!%p123_p5)
}
  0x10   :  { %s127_s28 = scalar_lea.vmem %s24_s20, 128  ;;  %p132_p7 = scmp.lt.s32.totalorder %s24_s20, %s24_s20 }
  0x11   :  { %p128_p6 = scmp.ne.s32.totalorder %s24_s20, %s127_s28  ;;  %p133_p8 = scmp.lt.s32.totalorder %s127_s28, %s127_s28 }
  0x13   :  { %p134_p9 = por %p133_p8, %p132_p7 }
  0x15   :  { %p135_p10 = pnand %p134_p9, %p128_p6 }
  0x17   :  { %138 = shalt.err (!%p135_p10)
}
  0x18   :  { %s169_s0 = smov 32   ;;  %s170_s29 = smov 2  }
  0x19   :  { %29 = dma.hbm_to_vmem [thread:$0]  %s230_s1, 128, %s24_s20, [#allocation3], %s169_s0, %s169_s0, %s170_s29  }
  0x1a   :  { %161 = dma.done.wait [#allocation5], 32  }
  0x1b   :  { %162 = vsyncadd [#allocation5], 4294967264 }
  0x1c   :  { %163 = dma.done.wait [#allocation3], 128  }
  0x1d   :  { %164 = vsyncadd [#allocation3], 4294967168 }
  0x1e   :  { %36 = sfence }
  0x1f   :  { %s37_s4 = sld [smem:[#allocation2]]  ;;  %s95_s5 = sld [smem:[#allocation2 + $0x1]]  ;;  %v45_v0 = vld [vmem:[#allocation6] sm:$0x3]  ;;  %v51_v1 = vld [vmem:[#allocation6 + $0x2] sm:$0x3] }
  0x20   :  { %s96_s6 = sld [smem:[#allocation2 + $0x2]]  ;;  %s97_s7 = sld [smem:[#allocation2 + $0x3]]  ;;  %v59_v2 = vld [vmem:[#allocation6 + $0x4] sm:$0x3]  ;;  %v67_v3 = vld [vmem:[#allocation6 + $0x6] sm:$0x3] }
  0x21   :  { %s98_s8 = sld [smem:[#allocation2 + $0x80]]  ;;  %s99_s9 = sld [smem:[#allocation2 + $0x81]] }
  0x22   :  { %s100_s10 = sld [smem:[#allocation2 + $0x82]]  ;;  %s101_s11 = sld [smem:[#allocation2 + $0x83]] }
  0x23   :  { %s171_s1 = smov [#allocation7]  }
  0x24   :  { %s82_s12 = sshll.u32 %s171_s1, 4  ;;  %s83_s12 = int_to_ptr.vmem [resolvable:$true] %s82_s12 }
  0x25   :  { %v46_v4 = vstv %s37_s4  ;;  %v52_v5 = vstv %s95_s5  ;;  %s139_s13 = scalar_lea.vmem %s83_s12, 64  ;;  %p144_p12 = scmp.lt.s32.totalorder %s83_s12, %s83_s12 }
  0x26   :  { %v47_v6 = vmul.f32 %v46_v4, %v45_v0  ;;  %v53_v7 = vmul.f32 %v52_v5, %v51_v1  ;;  %v60_v8 = vstv %s96_s6  ;;  %v68_v9 = vstv %s97_s7  ;;  %p140_p11 = scmp.ne.s32.totalorder %s83_s12, %s139_s13  ;;  %p145_p13 = scmp.lt.s32.totalorder %s139_s13, %s139_s13 }
  0x27   :  { %v61_v10 = vmul.f32 %v60_v8, %v59_v2  ;;  %v69_v11 = vmul.f32 %v68_v9, %v67_v3  ;;  %v48_v12 = vstv %s98_s8  ;;  %v55_v15 = vstv %s99_s9 }
  0x28   :  { %v54_v13 = vadd.f32 %v53_v7, %v47_v6  ;;  %v49_v14 = vmul.f32 %v48_v12, %v45_v0  ;;  %v63_v16 = vstv %s100_s10  ;;  %v56_v17 = vmul.f32 %v55_v15, %v51_v1  ;;  %p146_p0 = por %p145_p13, %p144_p12 }
  0x29   :  { %v64_v18 = vmul.f32 %v63_v16, %v59_v2  ;;  %v71_v19 = vstv %s101_s11 }
  0x2a   :  { %v62_v20 = vadd.f32 %v61_v10, %v54_v13  ;;  %v57_v21 = vadd.f32 %v56_v17, %v49_v14  ;;  %v72_v22 = vmul.f32 %v71_v19, %v67_v3  ;;  %p147_p1 = pnand %p146_p0, %p140_p11 }
  0x2c   :  { %v70_v23 = vadd.f32 %v69_v11, %v62_v20  ;;  %v65_v24 = vadd.f32 %v64_v18, %v57_v21 }
  0x2e   :  { %74 = vst [vmem:[#allocation7] sm:$0x3] %v70_v23  ;;  %v73_v25 = vadd.f32 %v72_v22, %v65_v24 }
  0x30   :  { %76 = vst [vmem:[#allocation7 + $0x2] sm:$0x3] %v73_v25 }
  0x31   :  { %150 = shalt.err (!%p147_p1)
}
  0x32   :  { %s151_s16 = scalar_lea.hbm %s231_s2, 64 }
  0x33   :  { %p152_p2 = scmp.ne.s32.totalorder %s231_s2, %s151_s16  ;;  %p155_p3 = scmp.lt.u32.totalorder %s151_s16, %s231_s2 }
  0x35   :  { %p157_p4 = pnand %p155_p3, %p152_p2 }
  0x37   :  { %160 = shalt.err (!%p157_p4)
}
  0x38   :  { %88 = dma.vmem_to_hbm [thread:$0]  %s83_s12, 64, %s231_s2, [#allocation4], %s169_s0, %s169_s0, %s170_s29  }
  0x39   :  { %165 = dma.done.wait [#allocation4], 64  }
  0x3a   :  { %166 = vsyncadd [#allocation4], 4294967232 }
  0x3b   :  { %92 = vsyncpa [#allocation3], 1 }
  0x3c   :  { %93 = vsyncpa [#allocation4], 1 }
  0x3d   :  { %94 = vsyncpa [#allocation5], 1 }

</bundles_post_ra>
